<compile_context>
chip_gen: v6e
topology: v6e:2x2x1
jax: 0.10.0
libtpu: 0.0.40
codegen_flags: <defaults>
</compile_context>

<pallas_src>
import jax
import jax.numpy as jnp
from jax.experimental import pallas as pl
from jax.experimental.pallas import tpu as pltpu


def _round_up(x: int, m: int) -> int:
    return ((x + m - 1) // m) * m


def _mlp_kernel(state_ref, w1_ref, b1_ref, w2_ref, b2_ref, out_ref):
    # One (TB, D) tile of states per grid step; both matmuls + ReLU on-chip.
    x = state_ref[...]                                                 # (TB, D)
    h = jnp.dot(x, w1_ref[...], preferred_element_type=jnp.float32)   # (TB, Hp)
    h = jnp.maximum(h + b1_ref[...], 0.0)                             # ReLU
    q = jnp.dot(h.astype(w2_ref.dtype), w2_ref[...],
                preferred_element_type=jnp.float32)                   # (TB, Ap)
    out_ref[...] = (q + b2_ref[...]).astype(out_ref.dtype)


def make_network(w1, b1, w2, b2, *, block_b=4096, compute_dtype=None):
    """Pad parameters once and return a jitted `forward(state) -> q_values`.

    w1: (input_size, 30)   b1: (30,) or (1, 30)
    w2: (30, nb_action)    b2: (nb_action,) or (1, nb_action)
    forward(state): state (B, input_size) f32 -> (B, nb_action) f32
    """
    w1 = jnp.asarray(w1, jnp.float32)
    w2 = jnp.asarray(w2, jnp.float32)
    D, H = w1.shape
    A = w2.shape[1]
    b1 = jnp.reshape(jnp.asarray(b1, jnp.float32), (1, H))
    b2 = jnp.reshape(jnp.asarray(b2, jnp.float32), (1, A))

    dtype_in = jnp.dtype(compute_dtype) if compute_dtype is not None else jnp.dtype(jnp.float32)

    # Layout-friendly padded dims (zero padding keeps the math exact).
    H_pad = _round_up(H, 128)   # hidden: lane-dense (30 -> 128)
    A_pad = _round_up(A, 8)     # action: small pad only; block last dim == full dim
    row_align = 16 if dtype_in.itemsize == 2 else 8

    # ---- pad parameters ONCE (cached, reused by every forward call) --------
    w1p = jnp.zeros((D, H_pad), dtype_in).at[:, :H].set(w1.astype(dtype_in))
    b1p = jnp.zeros((1, H_pad), jnp.float32).at[:, :H].set(b1)
    w2p = jnp.zeros((H_pad, A_pad), dtype_in).at[:H, :A].set(w2.astype(dtype_in))
    b2p = jnp.zeros((1, A_pad), jnp.float32).at[:, :A].set(b2)

    @jax.jit
    def forward(state):
        squeeze = state.ndim == 1
        if squeeze:
            state = state[None, :]
        B = state.shape[0]

        # Batch tiling; guarantee >= 2 grid steps for large batches so the
        # "parallel" axis can be split across both TensorCores on v7x.
        B_aligned = _round_up(B, row_align)
        TB = min(block_b, B_aligned)
        if TB >= B_aligned and B_aligned >= 2 * row_align:
            TB = _round_up(B_aligned // 2, row_align)
        B_pad = _round_up(B_aligned, TB)
        grid = (B_pad // TB,)

        state_p = state.astype(dtype_in)
        if B_pad != B:
            state_p = jnp.pad(state_p, ((0, B_pad - B), (0, 0)))

        out = pl.pallas_call(
            _mlp_kernel,
            out_shape=jax.ShapeDtypeStruct((B_pad, A_pad), jnp.float32),
            grid=grid,
            in_specs=[
                pl.BlockSpec((TB, D), lambda i: (i, 0)),          # state: batch-tiled
                pl.BlockSpec((D, H_pad), lambda i: (0, 0)),       # w1: VMEM-resident
                pl.BlockSpec((1, H_pad), lambda i: (0, 0)),       # b1: VMEM-resident
                pl.BlockSpec((H_pad, A_pad), lambda i: (0, 0)),   # w2: VMEM-resident
                pl.BlockSpec((1, A_pad), lambda i: (0, 0)),       # b2: VMEM-resident
            ],
            out_specs=pl.BlockSpec((TB, A_pad), lambda i: (i, 0)),
            compiler_params=pltpu.CompilerParams(
                dimension_semantics=("parallel",),
            ),
        )(state_p, w1p, b1p, w2p, b2p)

        if B_pad != B or A_pad != A:
            out = out[:B, :A]
        return out[0] if squeeze else out

    return forward


def init_params(key, input_size, nb_action, hidden=30):
    """Deterministic init mirroring torch.nn.Linear's U(-1/sqrt(fan_in), 1/sqrt(fan_in))."""
    k1, k2, k3, k4 = jax.random.split(key, 4)
    bound1 = 1.0 / jnp.sqrt(jnp.float32(input_size))
    bound2 = 1.0 / jnp.sqrt(jnp.float32(hidden))
    w1 = jax.random.uniform(k1, (input_size, hidden), jnp.float32, -bound1, bound1)
    b1 = jax.random.uniform(k2, (1, hidden), jnp.float32, -bound1, bound1)
    w2 = jax.random.uniform(k3, (hidden, nb_action), jnp.float32, -bound2, bound2)
    b2 = jax.random.uniform(k4, (1, nb_action), jnp.float32, -bound2, bound2)
    return w1, b1, w2, b2


def _reference(state, w1, b1, w2, b2):
    return jnp.maximum(state @ w1 + b1, 0.0) @ w2 + b2


if __name__ == "__main__":
    key = jax.random.PRNGKey(0)
    k_params, k_state, k_state2 = jax.random.split(key, 3)

    batch = 2
    input_size = 8       # small state vector
    nb_action = 4

    w1, b1, w2, b2 = init_params(k_params, input_size, nb_action)

    # Build the network once: parameters are padded once and the forward is jitted.
    forward = make_network(w1, b1, w2, b2)

    # --- small, per-step-sized call (matches the PyTorch module usage) ------
    state = jax.random.normal(k_state, (batch, input_size), jnp.float32)
    q_values = jax.block_until_ready(forward(state))
    ref = _reference(state, w1, b1, w2, b2)
    assert q_values.shape == (batch, nb_action)
    assert jnp.allclose(q_values, ref, atol=1e-5, rtol=1e-5)

    # --- batched call: default blocking splits into >=2 grid steps (v7x) ----
    big_batch = 80
    state_big = jax.random.normal(k_state2, (big_batch, input_size), jnp.float32)
    q_big = jax.block_until_ready(forward(state_big))
    ref_big = _reference(state_big, w1, b1, w2, b2)
    assert q_big.shape == (big_batch, nb_action)
    assert jnp.allclose(q_big, ref_big, atol=1e-5, rtol=1e-5)

    # --- explicit small block size exercising a multi-step grid (grid=(3,)) -
    forward_b32 = make_network(w1, b1, w2, b2, block_b=32)
    q_big32 = jax.block_until_ready(forward_b32(state_big))
    assert jnp.allclose(q_big32, ref_big, atol=1e-5, rtol=1e-5)

    print("KERNEL_OK")
</pallas_src>

<mosaic_0001>
module attributes {stable_mosaic.version = 11 : i64} {
  func.func @_mlp_kernel(%arg0: i32, %arg1: memref<8x8xf32, #tpu.memory_space<vmem>>, %arg2: memref<8x128xf32, #tpu.memory_space<vmem>>, %arg3: memref<1x128xf32, #tpu.memory_space<vmem>>, %arg4: memref<128x8xf32, #tpu.memory_space<vmem>>, %arg5: memref<1x8xf32, #tpu.memory_space<vmem>>, %arg6: memref<8x8xf32, #tpu.memory_space<vmem>>) attributes {dimension_semantics = [#tpu.dimension_semantics<parallel>], iteration_bounds = array<i64: 1>, scalar_prefetch = 0 : i64, scratch_operands = 0 : i64, tpu.core_type = #tpu.core_type<tc>, window_params = [{transform_indices = @transform_0, window_bounds = array<i64: 8, 8>}, {pipeline_mode = #tpu.pipeline_mode<synchronous>, transform_indices = @transform_1, window_bounds = array<i64: 8, 128>}, {pipeline_mode = #tpu.pipeline_mode<synchronous>, transform_indices = @transform_2, window_bounds = array<i64: 1, 128>}, {pipeline_mode = #tpu.pipeline_mode<synchronous>, transform_indices = @transform_3, window_bounds = array<i64: 128, 8>}, {pipeline_mode = #tpu.pipeline_mode<synchronous>, transform_indices = @transform_4, window_bounds = array<i64: 1, 8>}, {transform_indices = @transform_5, window_bounds = array<i64: 8, 8>}]} {
    %c0 = arith.constant 0 : index
    %c0_0 = arith.constant 0 : index
    %0 = vector.load %arg1[%c0, %c0_0] : memref<8x8xf32, #tpu.memory_space<vmem>>, vector<8x8xf32>
    %c0_1 = arith.constant 0 : index
    %c0_2 = arith.constant 0 : index
    %1 = vector.load %arg2[%c0_1, %c0_2] : memref<8x128xf32, #tpu.memory_space<vmem>>, vector<8x128xf32>
    %cst = arith.constant dense<0.000000e+00> : vector<8x128xf32>
    %2 = tpu.matmul %0, %1, %cst {dimension_numbers = #tpu.dot_dimension_numbers<[1], [0], [0], [1], [0, 0, 1, 1], [], []>} : vector<8x8xf32>, vector<8x128xf32>, vector<8x128xf32> -> vector<8x128xf32>
    %c0_3 = arith.constant 0 : index
    %c0_4 = arith.constant 0 : index
    %3 = vector.load %arg3[%c0_3, %c0_4] : memref<1x128xf32, #tpu.memory_space<vmem>>, vector<1x128xf32>
    %4 = vector.broadcast %3 : vector<1x128xf32> to vector<8x128xf32>
    %5 = arith.addf %2, %4 : vector<8x128xf32>
    %cst_5 = arith.constant 0.000000e+00 : f32
    %6 = vector.broadcast %cst_5 : f32 to vector<8x128xf32>
    %7 = arith.maximumf %5, %6 : vector<8x128xf32>
    %c0_6 = arith.constant 0 : index
    %c0_7 = arith.constant 0 : index
    %8 = vector.load %arg4[%c0_6, %c0_7] : memref<128x8xf32, #tpu.memory_space<vmem>>, vector<128x8xf32>
    %cst_8 = arith.constant dense<0.000000e+00> : vector<8x8xf32>
    %9 = tpu.matmul %7, %8, %cst_8 {dimension_numbers = #tpu.dot_dimension_numbers<[1], [0], [0], [1], [0, 0, 1, 1], [], []>} : vector<8x128xf32>, vector<128x8xf32>, vector<8x8xf32> -> vector<8x8xf32>
    %c0_9 = arith.constant 0 : index
    %c0_10 = arith.constant 0 : index
    %10 = vector.load %arg5[%c0_9, %c0_10] : memref<1x8xf32, #tpu.memory_space<vmem>>, vector<1x8xf32>
    %11 = vector.broadcast %10 : vector<1x8xf32> to vector<8x8xf32>
    %12 = arith.addf %9, %11 : vector<8x8xf32>
    %c0_11 = arith.constant 0 : index
    %c0_12 = arith.constant 0 : index
    %13 = vector.load %arg6[%c0_11, %c0_12] : memref<8x8xf32, #tpu.memory_space<vmem>>, vector<8x8xf32>
    tpu.vector_store %arg6[%c0_11, %c0_12], %12 {strides = array<i32>} : memref<8x8xf32, #tpu.memory_space<vmem>>, vector<8x8xf32>,
    return
  }
  func.func @transform_0(%arg0: i32) -> (i32, i32) {
    %c0_i32 = arith.constant 0 : i32
    %c0_i32_0 = arith.constant 0 : i32
    return %arg0, %c0_i32 : i32, i32
  }
  func.func @transform_1(%arg0: i32) -> (i32, i32) {
    %c0_i32 = arith.constant 0 : i32
    %c0_i32_0 = arith.constant 0 : i32
    %c0_i32_1 = arith.constant 0 : i32
    return %c0_i32, %c0_i32_0 : i32, i32
  }
  func.func @transform_2(%arg0: i32) -> (i32, i32) {
    %c0_i32 = arith.constant 0 : i32
    %c0_i32_0 = arith.constant 0 : i32
    %c0_i32_1 = arith.constant 0 : i32
    return %c0_i32, %c0_i32_0 : i32, i32
  }
  func.func @transform_3(%arg0: i32) -> (i32, i32) {
    %c0_i32 = arith.constant 0 : i32
    %c0_i32_0 = arith.constant 0 : i32
    %c0_i32_1 = arith.constant 0 : i32
    return %c0_i32, %c0_i32_0 : i32, i32
  }
  func.func @transform_4(%arg0: i32) -> (i32, i32) {
    %c0_i32 = arith.constant 0 : i32
    %c0_i32_0 = arith.constant 0 : i32
    %c0_i32_1 = arith.constant 0 : i32
    return %c0_i32, %c0_i32_0 : i32, i32
  }
  func.func @transform_5(%arg0: i32) -> (i32, i32) {
    %c0_i32 = arith.constant 0 : i32
    %c0_i32_0 = arith.constant 0 : i32
    return %arg0, %c0_i32 : i32, i32
  }
}

</mosaic_0001>

<bundles_post_ra>
// kernel: forward.1
= control target key start
LH: loop header
LB: loop body
LE: loop exit
PB: predicated region body
PF: predicated region fallthrough
CT: control target
= control target key end

     0   :  { %10 = vsyncpa [#allocation3], 0  ;;  %s306_s18 = smov [#allocation2]   ;;  %s361_s0 = inlined_call_operand.vmem [shape: f32[8,8], index: 0, kind: input, shape index: {}]   ;;  %s362_s1 = inlined_call_operand.vmem [shape: f32[8,128], index: 1, kind: input, shape index: {}]   ;;  %s363_s2 = inlined_call_operand.vmem [shape: f32[1,128], index: 2, kind: input, shape index: {}]   ;;  %s364_s3 = inlined_call_operand.hbm [shape: f32[128,8], index: 3, kind: input, shape index: {}]   ;;  %s365_s4 = inlined_call_operand.vmem [shape: f32[1,8], index: 4, kind: input, shape index: {}]   ;;  %s366_s5 = inlined_call_operand.vmem [shape: f32[8,8], index: 5, kind: output, shape index: {}]  }
   0x1   :  { %s22_s19 = sshll.u32 %s306_s18, 4  ;;  %s23_s19 = int_to_ptr.vmem [resolvable:$true] %s22_s19 }
   0x2   :  { %s292_s20 = scalar_lea.vmem %s23_s19, 2048  ;;  %p297_p1 = scmp.lt.s32.totalorder %s23_s19, %s23_s19 }
   0x3   :  { %p293_p0 = scmp.ne.s32.totalorder %s23_s19, %s292_s20  ;;  %p298_p2 = scmp.lt.s32.totalorder %s292_s20, %s292_s20 }
   0x5   :  { %p299_p3 = por %p298_p2, %p297_p1 }
   0x7   :  { %p300_p4 = pnand %p299_p3, %p293_p0 }
   0x9   :  { %303 = shalt.err (!%p300_p4)
}
   0xa   :  { %s307_s21 = smov 128   ;;  %s308_s22 = smov 8  }
   0xb   :  { %28 = dma.hbm_to_vmem [thread:$0]  %s364_s3, 2048, %s23_s19, [#allocation3], %s307_s21, %s307_s21, %s308_s22  }
   0xc   :  { %304 = dma.done.wait [#allocation3], 2048  }
   0xd   :  { %305 = vsyncadd [#allocation3], 4294965248  ;;  %v309_v0 = vmov 0.0   ;;  %vm310_vm0 = vmmov 0   ;;  %vm43_vm1 = vcmask 64512   ;;  %v35_v1 = vld [vmem:[%s362_s1] sm:$0xff] }
   0xe   :  { %239 = vmatprep.subr.mxu0 %v309_v0  ;;  %241 = vmatprep.mubr.msk.f32.mxu0 %vm310_vm0, %v309_v0  ;;  %v34_v2 = vld [vmem:[%s361_s0] sm:$0xff]  ;;  %v133_v3 = vld [vmem:[#allocation2 + $0x78] sm:$0xff]  ;;  %v132_v4 = vld [vmem:[#allocation2 + $0x70] sm:$0xff] }
   0xf   :  { %244 = vmatprep.subr.mxu1 %v309_v0  ;;  %276 = vmatprep.mubr.msk.f32.mxu1 %vm310_vm0, %v309_v0  ;;  %v131_v5 = vld [vmem:[#allocation2 + $0x68] sm:$0xff]  ;;  %v130_v6 = vld [vmem:[#allocation2 + $0x60] sm:$0xff]  ;;  %v129_v7 = vld [vmem:[#allocation2 + $0x58] sm:$0xff] }
  0x10   :  { %240 = vmatpush3.msra.mxu0 %v35_v1  ;;  %245 = vmatpush3.msra.mxu1 %v133_v3  ;;  %v128_v8 = vld [vmem:[#allocation2 + $0x50] sm:$0xff]  ;;  %v127_v9 = vld [vmem:[#allocation2 + $0x48] sm:$0xff]  ;;  %v126_v10 = vld [vmem:[#allocation2 + $0x40] sm:$0xff] }
  0x11   :  { %242 = vmatmul.mubr.msk.f32.vlgmr.msra.gmra.mxu0 %vm43_vm1, %v34_v2  ;;  %246 = vmatprep.subr.mxu1 %v309_v0  ;;  %v125_v11 = vld [vmem:[#allocation2 + $0x38] sm:$0xff]  ;;  %v124_v12 = vld [vmem:[#allocation2 + $0x30] sm:$0xff]  ;;  %v123_v13 = vld [vmem:[#allocation2 + $0x28] sm:$0xff] }
  0x12   :  { %247 = vmatpush3.msra.mxu1 %v132_v4  ;;  %v122_v14 = vld [vmem:[#allocation2 + $0x20] sm:$0xff]  ;;  %v121_v15 = vld [vmem:[#allocation2 + $0x18] sm:$0xff]  ;;  %v120_v16 = vld [vmem:[#allocation2 + $0x10] sm:$0xff] }
  0x13   :  { %248 = vmatprep.subr.mxu1 %v309_v0  ;;  %v119_v17 = vld [vmem:[#allocation2 + $0x8] sm:$0xff]  ;;  %v118_v18 = vld [vmem:[#allocation2] sm:$0xff] }
  0x14   :  { %249 = vmatpush3.msra.mxu1 %v131_v5  ;;  %v217_v19 = vld [vmem:[%s363_s2] ss:$0 sm:$0xff] }
  0x15   :  { %250 = vmatprep.subr.mxu1 %v309_v0  ;;  %v219_v24 = vld [vmem:[%s365_s4] ss:$0 sm:$0xff] }
  0x16   :  { %251 = vmatpush3.msra.mxu1 %v130_v6 }
  0x17   :  { %252 = vmatprep.subr.mxu1 %v309_v0 }
  0x18   :  { %253 = vmatpush3.msra.mxu1 %v129_v7 }
  0x19   :  { %254 = vmatprep.subr.mxu1 %v309_v0 }
  0x1a   :  { %255 = vmatpush3.msra.mxu1 %v128_v8 }
  0x1b   :  { %256 = vmatprep.subr.mxu1 %v309_v0 }
  0x1c   :  { %257 = vmatpush3.msra.mxu1 %v127_v9 }
  0x1d   :  { %258 = vmatprep.subr.mxu1 %v309_v0 }
  0x1e   :  { %259 = vmatpush3.msra.mxu1 %v126_v10 }
  0x1f   :  { %260 = vmatprep.subr.mxu1 %v309_v0 }
  0x20   :  { %261 = vmatpush3.msra.mxu1 %v125_v11 }
  0x21   :  { %262 = vmatprep.subr.mxu1 %v309_v0 }
  0x22   :  { %263 = vmatpush3.msra.mxu1 %v124_v12 }
  0x23   :  { %264 = vmatprep.subr.mxu1 %v309_v0 }
  0x24   :  { %265 = vmatpush3.msra.mxu1 %v123_v13 }
  0x25   :  { %266 = vmatprep.subr.mxu1 %v309_v0 }
  0x26   :  { %267 = vmatpush3.msra.mxu1 %v122_v14 }
  0x27   :  { %268 = vmatprep.subr.mxu1 %v309_v0 }
  0x28   :  { %269 = vmatpush3.msra.mxu1 %v121_v15 }
  0x29   :  { %270 = vmatprep.subr.mxu1 %v309_v0 }
  0x2a   :  { %271 = vmatpush3.msra.mxu1 %v120_v16 }
  0x2b   :  { %272 = vmatprep.subr.mxu1 %v309_v0 }
  0x2c   :  { %273 = vmatpush3.msra.mxu1 %v119_v17 }
  0x2d   :  { %274 = vmatprep.subr.mxu1 %v309_v0 }
  0x2e   :  { %275 = vmatpush3.msra.mxu1 %v118_v18 }
  0xd1   :  { %v113_v20 = vpop.f32.mrf.mxu0 }
  0xd2   :  { %v114_v21 = vadd.f32 %v217_v19, %v113_v20 }
  0xd3   :  { %v243_v22 = vpop.f32.mrf.mxu0 }
  0xd4   :  { %v117_v23 = vmax.f32 %v114_v21, 0.0 }
  0xd6   :  { %277 = vmatmul.mubr.f32.vlgmr.msra.gmra.mxu1 %v117_v23 }
 0x196   :  { %v207_v25 = vpop.f32.mrf.mxu1 }
 0x197   :  { %v208_v26 = vadd.f32 %v219_v24, %v207_v25 }
 0x198   :  { %v278_v27 = vpop.f32.mrf.mxu1 }
 0x199   :  { %211 = vst.msk [vmem:[%s366_s5] sm:$0xff] %vm43_vm1, %v208_v26 }
 0x19a   :  { %216 = vsyncpa [#allocation3], 1 }

</bundles_post_ra>
